<compile_context>
chip_gen: v7x
topology: tpu7x:2x2x1
jax: 0.10.0
libtpu: 0.0.40
codegen_flags: <defaults>
</compile_context>

<pallas_src>
import jax
import jax.numpy as jnp
from jax.experimental import pallas as pl
from jax.experimental.pallas import tpu as pltpu


def _fnn_kernel(xT_ref, uT_ref, w1_ref, b1_ref, w2_ref, b2_ref, out_ref):
    # xT_ref : (2, TM)   transposed x rows (features on sublanes, rows on lanes)
    # uT_ref : (1, TM)   transposed u rows
    # w1_ref : (H, 3)    layer-1 weight, PyTorch (out, in) layout
    # b1_ref : (H, 1)
    # w2_ref : (H, 2)    layer-2 weight transposed to (in, out)
    # b2_ref : (2, 1)
    # out_ref: (2, TM)
    x0 = xT_ref[0:1, :]          # (1, TM)
    x1 = xT_ref[1:2, :]          # (1, TM)
    u0 = uT_ref[...]             # (1, TM)

    w1 = w1_ref[...]             # (H, 3)
    # Layer 1 on the VPU: three outer-product FMAs + bias, no MXU.
    h = (w1[:, 0:1] * x0
         + w1[:, 1:2] * x1
         + w1[:, 2:3] * u0
         + b1_ref[...])          # (H, TM)
    h = jnp.maximum(h, 0.0)      # ReLU

    # Layer 2: two broadcast-multiplies + cross-sublane reductions (XLU).
    w2 = w2_ref[...]             # (H, 2)
    y0 = jnp.sum(h * w2[:, 0:1], axis=0, keepdims=True)   # (1, TM)
    y1 = jnp.sum(h * w2[:, 1:2], axis=0, keepdims=True)   # (1, TM)
    y = jnp.concatenate([y0, y1], axis=0) + b2_ref[...]   # (2, TM)

    out_ref[...] = y.astype(out_ref.dtype)


def simple_fnn_forward(x_seq, u_seq, params):
    """x_seq: (B, T, 2), u_seq: (B, T, 1) -> (B, T, 2)."""
    w1, b1, w2, b2 = params          # w1 (H, 3), b1 (H,), w2 (2, H), b2 (2,)
    B, T, dx = x_seq.shape
    H = w1.shape[0]
    M = B * T

    # Lane-dense layout plumbing (wrapper side): rows go on the lane axis.
    xT = jnp.transpose(x_seq.reshape(M, dx))   # (2, M)
    uT = u_seq.reshape(1, M)                   # (1, M)  (single feature: pure reshape)
    b1c = b1.reshape(H, 1).astype(jnp.float32)
    w2T = jnp.transpose(w2).astype(jnp.float32)   # (H, 2)
    b2c = b2.reshape(2, 1).astype(jnp.float32)

    # Row tile on the lane axis: >= 512 in the streaming regime, multiple of 128.
    TM = 1024
    if M < TM:
        TM = max(128, pl.cdiv(M, 128) * 128)
    M_pad = pl.cdiv(M, TM) * TM
    if M_pad != M:
        pad = M_pad - M
        xT = jnp.pad(xT, ((0, 0), (0, pad)))
        uT = jnp.pad(uT, ((0, 0), (0, pad)))

    grid = (M_pad // TM,)

    outT = pl.pallas_call(
        _fnn_kernel,
        out_shape=jax.ShapeDtypeStruct((2, M_pad), jnp.float32),
        grid=grid,
        in_specs=[
            # Streaming inputs: tiled over the lane (row) axis, double-buffered.
            pl.BlockSpec((2, TM), lambda i: (0, i)),
            pl.BlockSpec((1, TM), lambda i: (0, i)),
            # Weights / biases: full blocks, constant index_map -> VMEM-resident.
            pl.BlockSpec((H, 3), lambda i: (0, 0)),
            pl.BlockSpec((H, 1), lambda i: (0, 0)),
            pl.BlockSpec((H, 2), lambda i: (0, 0)),
            pl.BlockSpec((2, 1), lambda i: (0, 0)),
        ],
        out_specs=pl.BlockSpec((2, TM), lambda i: (0, i)),
        compiler_params=pltpu.CompilerParams(
            # Independent row tiles: lets v7x shard across both TensorCores;
            # harmless no-op on single-TC v5e/v6e.
            dimension_semantics=("parallel",),
        ),
    )(xT, uT, w1.astype(jnp.float32), b1c, w2T, b2c)

    return jnp.transpose(outT[:, :M]).reshape(B, T, 2)


def init_params(key, n_latent):
    """Deterministic init mirroring init_weights (PyTorch layouts):
    xavier_normal_ weights, normal biases."""
    k1, k2, k3, k4 = jax.random.split(key, 4)
    # Layer 1: Linear(3, n_latent) -> weight (n_latent, 3), bias (n_latent,)
    std1 = (2.0 / (3 + n_latent)) ** 0.5
    w1 = jax.random.normal(k1, (n_latent, 3), jnp.float32) * std1
    b1 = jax.random.normal(k2, (n_latent,), jnp.float32)
    # Layer 2: Linear(n_latent, 2) -> weight (2, n_latent), bias (2,)
    std2 = (2.0 / (n_latent + 2)) ** 0.5
    w2 = jax.random.normal(k3, (2, n_latent), jnp.float32) * std2
    b2 = jax.random.normal(k4, (2,), jnp.float32)
    return (w1, b1, w2, b2)


def _reference_forward(x_seq, u_seq, params):
    w1, b1, w2, b2 = params
    xu = jnp.concatenate([x_seq, u_seq], axis=-1)       # (B, T, 3)
    h = jnp.maximum(xu @ w1.T + b1, 0.0)                # (B, T, H)
    return h @ w2.T + b2                                # (B, T, 2)


if __name__ == "__main__":
    key = jax.random.PRNGKey(0)
    kx, ku, kp = jax.random.split(key, 3)

    B, T = 2, 8
    n_latent = 32
    x_seq = jax.random.normal(kx, (B, T, 2), jnp.float32)
    u_seq = jax.random.normal(ku, (B, T, 1), jnp.float32)
    params = init_params(kp, n_latent)

    out = simple_fnn_forward(x_seq, u_seq, params)
    out = jax.block_until_ready(out)

    ref = _reference_forward(x_seq, u_seq, params)
    assert out.shape == (B, T, 2)
    assert jnp.allclose(out, ref, atol=1e-5, rtol=1e-5)

    print("KERNEL_OK")
</pallas_src>

<mosaic_0001>
module attributes {stable_mosaic.version = 11 : i64} {
  func.func @_fnn_kernel(%arg0: i32, %arg1: memref<2x128xf32, #tpu.memory_space<vmem>>, %arg2: memref<1x128xf32, #tpu.memory_space<vmem>>, %arg3: memref<32x3xf32, #tpu.memory_space<vmem>>, %arg4: memref<32x1xf32, #tpu.memory_space<vmem>>, %arg5: memref<32x2xf32, #tpu.memory_space<vmem>>, %arg6: memref<2x1xf32, #tpu.memory_space<vmem>>, %arg7: memref<2x128xf32, #tpu.memory_space<vmem>>) attributes {dimension_semantics = [#tpu.dimension_semantics<parallel>], iteration_bounds = array<i64: 1>, scalar_prefetch = 0 : i64, scratch_operands = 0 : i64, tpu.core_type = #tpu.core_type<tc>, window_params = [{transform_indices = @transform_0, window_bounds = array<i64: 2, 128>}, {transform_indices = @transform_1, window_bounds = array<i64: 1, 128>}, {pipeline_mode = #tpu.pipeline_mode<synchronous>, transform_indices = @transform_2, window_bounds = array<i64: 32, 3>}, {pipeline_mode = #tpu.pipeline_mode<synchronous>, transform_indices = @transform_3, window_bounds = array<i64: 32, 1>}, {pipeline_mode = #tpu.pipeline_mode<synchronous>, transform_indices = @transform_4, window_bounds = array<i64: 32, 2>}, {pipeline_mode = #tpu.pipeline_mode<synchronous>, transform_indices = @transform_5, window_bounds = array<i64: 2, 1>}, {transform_indices = @transform_6, window_bounds = array<i64: 2, 128>}]} {
    %c0 = arith.constant 0 : index
    %c0_0 = arith.constant 0 : index
    %0 = vector.load %arg1[%c0, %c0_0] : memref<2x128xf32, #tpu.memory_space<vmem>>, vector<1x128xf32>
    %c1 = arith.constant 1 : index
    %c0_1 = arith.constant 0 : index
    %1 = vector.load %arg1[%c1, %c0_1] : memref<2x128xf32, #tpu.memory_space<vmem>>, vector<1x128xf32>
    %c0_2 = arith.constant 0 : index
    %c0_3 = arith.constant 0 : index
    %2 = vector.load %arg2[%c0_2, %c0_3] : memref<1x128xf32, #tpu.memory_space<vmem>>, vector<1x128xf32>
    %c0_4 = arith.constant 0 : index
    %c0_5 = arith.constant 0 : index
    %3 = vector.load %arg3[%c0_4, %c0_5] : memref<32x3xf32, #tpu.memory_space<vmem>>, vector<32x3xf32>
    %4 = vector.extract_strided_slice %3 {offsets = [0, 0], sizes = [32, 1], strides = [1, 1]} : vector<32x3xf32> to vector<32x1xf32>
    %5 = vector.broadcast %4 : vector<32x1xf32> to vector<32x128xf32>
    %6 = vector.broadcast %0 : vector<1x128xf32> to vector<32x128xf32>
    %7 = arith.mulf %5, %6 : vector<32x128xf32>
    %8 = vector.extract_strided_slice %3 {offsets = [0, 1], sizes = [32, 1], strides = [1, 1]} : vector<32x3xf32> to vector<32x1xf32>
    %9 = vector.broadcast %8 : vector<32x1xf32> to vector<32x128xf32>
    %10 = vector.broadcast %1 : vector<1x128xf32> to vector<32x128xf32>
    %11 = arith.mulf %9, %10 : vector<32x128xf32>
    %12 = arith.addf %7, %11 : vector<32x128xf32>
    %13 = vector.extract_strided_slice %3 {offsets = [0, 2], sizes = [32, 1], strides = [1, 1]} : vector<32x3xf32> to vector<32x1xf32>
    %14 = vector.broadcast %13 : vector<32x1xf32> to vector<32x128xf32>
    %15 = vector.broadcast %2 : vector<1x128xf32> to vector<32x128xf32>
    %16 = arith.mulf %14, %15 : vector<32x128xf32>
    %17 = arith.addf %12, %16 : vector<32x128xf32>
    %c0_6 = arith.constant 0 : index
    %c0_7 = arith.constant 0 : index
    %18 = vector.load %arg4[%c0_6, %c0_7] : memref<32x1xf32, #tpu.memory_space<vmem>>, vector<32x1xf32>
    %19 = vector.broadcast %18 : vector<32x1xf32> to vector<32x128xf32>
    %20 = arith.addf %17, %19 : vector<32x128xf32>
    %cst = arith.constant 0.000000e+00 : f32
    %21 = vector.broadcast %cst : f32 to vector<32x128xf32>
    %22 = arith.maximumf %20, %21 : vector<32x128xf32>
    %c0_8 = arith.constant 0 : index
    %c0_9 = arith.constant 0 : index
    %23 = vector.load %arg5[%c0_8, %c0_9] : memref<32x2xf32, #tpu.memory_space<vmem>>, vector<32x2xf32>
    %24 = vector.extract_strided_slice %23 {offsets = [0, 0], sizes = [32, 1], strides = [1, 1]} : vector<32x2xf32> to vector<32x1xf32>
    %25 = vector.broadcast %24 : vector<32x1xf32> to vector<32x128xf32>
    %26 = arith.mulf %22, %25 : vector<32x128xf32>
    %cst_10 = arith.constant dense<0.000000e+00> : vector<128xf32>
    %27 = vector.multi_reduction <add>, %26, %cst_10 [0] : vector<32x128xf32> to vector<128xf32>
    %28 = vector.shape_cast %27 : vector<128xf32> to vector<1x128xf32>
    %29 = vector.extract_strided_slice %23 {offsets = [0, 1], sizes = [32, 1], strides = [1, 1]} : vector<32x2xf32> to vector<32x1xf32>
    %30 = vector.broadcast %29 : vector<32x1xf32> to vector<32x128xf32>
    %31 = arith.mulf %22, %30 : vector<32x128xf32>
    %cst_11 = arith.constant dense<0.000000e+00> : vector<128xf32>
    %32 = vector.multi_reduction <add>, %31, %cst_11 [0] : vector<32x128xf32> to vector<128xf32>
    %33 = vector.shape_cast %32 : vector<128xf32> to vector<1x128xf32>
    %34 = tpu.concatenate %28, %33 in 0 : vector<1x128xf32>, vector<1x128xf32> -> vector<2x128xf32>
    %c0_12 = arith.constant 0 : index
    %c0_13 = arith.constant 0 : index
    %35 = vector.load %arg6[%c0_12, %c0_13] : memref<2x1xf32, #tpu.memory_space<vmem>>, vector<2x1xf32>
    %36 = vector.broadcast %35 : vector<2x1xf32> to vector<2x128xf32>
    %37 = arith.addf %34, %36 : vector<2x128xf32>
    %c0_14 = arith.constant 0 : index
    %c0_15 = arith.constant 0 : index
    %38 = vector.load %arg7[%c0_14, %c0_15] : memref<2x128xf32, #tpu.memory_space<vmem>>, vector<2x128xf32>
    tpu.vector_store %arg7[%c0_14, %c0_15], %37 {strides = array<i32>} : memref<2x128xf32, #tpu.memory_space<vmem>>, vector<2x128xf32>,
    return
  }
  func.func @transform_0(%arg0: i32) -> (i32, i32) {
    %c0_i32 = arith.constant 0 : i32
    %c0_i32_0 = arith.constant 0 : i32
    return %c0_i32, %arg0 : i32, i32
  }
  func.func @transform_1(%arg0: i32) -> (i32, i32) {
    %c0_i32 = arith.constant 0 : i32
    %c0_i32_0 = arith.constant 0 : i32
    return %c0_i32, %arg0 : i32, i32
  }
  func.func @transform_2(%arg0: i32) -> (i32, i32) {
    %c0_i32 = arith.constant 0 : i32
    %c0_i32_0 = arith.constant 0 : i32
    %c0_i32_1 = arith.constant 0 : i32
    return %c0_i32, %c0_i32_0 : i32, i32
  }
  func.func @transform_3(%arg0: i32) -> (i32, i32) {
    %c0_i32 = arith.constant 0 : i32
    %c0_i32_0 = arith.constant 0 : i32
    %c0_i32_1 = arith.constant 0 : i32
    return %c0_i32, %c0_i32_0 : i32, i32
  }
  func.func @transform_4(%arg0: i32) -> (i32, i32) {
    %c0_i32 = arith.constant 0 : i32
    %c0_i32_0 = arith.constant 0 : i32
    %c0_i32_1 = arith.constant 0 : i32
    return %c0_i32, %c0_i32_0 : i32, i32
  }
  func.func @transform_5(%arg0: i32) -> (i32, i32) {
    %c0_i32 = arith.constant 0 : i32
    %c0_i32_0 = arith.constant 0 : i32
    %c0_i32_1 = arith.constant 0 : i32
    return %c0_i32, %c0_i32_0 : i32, i32
  }
  func.func @transform_6(%arg0: i32) -> (i32, i32) {
    %c0_i32 = arith.constant 0 : i32
    %c0_i32_0 = arith.constant 0 : i32
    return %c0_i32, %arg0 : i32, i32
  }
}

</mosaic_0001>

<bundles_post_ra>
// kernel: tpu_custom_call.1
= control target key start
LH: loop header
LB: loop body
LE: loop exit
PB: predicated region body
PF: predicated region fallthrough
CT: control target
= control target key end

     0   :  { %v282_v1 = vmov 2   ;;  %v283_v2 = vmov 1   ;;  %s381_s0 = inlined_call_operand.vmem [shape: f32[2,128], index: 0, kind: input, shape index: {}]   ;;  %s382_s1 = inlined_call_operand.vmem [shape: f32[1,128], index: 1, kind: input, shape index: {}]   ;;  %s383_s2 = inlined_call_operand.vmem [shape: f32[32,3], index: 2, kind: input, shape index: {}]   ;;  %s384_s3 = inlined_call_operand.vmem [shape: f32[32,1], index: 3, kind: input, shape index: {}]   ;;  %s385_s4 = inlined_call_operand.vmem [shape: f32[32,2], index: 4, kind: input, shape index: {}]   ;;  %s386_s5 = inlined_call_operand.vmem [shape: f32[2,1], index: 5, kind: input, shape index: {}]   ;;  %s387_s6 = inlined_call_operand.hbm [shape: f32[2,128], index: 6, kind: output, shape index: {}]  }
   0x1   :  { %v27_v0 = vld [vmem:[%s383_s2] sm:$0xff]  ;;  %247 = vset.pattern.permute.xlu0 %v282_v1  ;;  %246 = vset.pattern.permute.xlu1 %v283_v2  ;;  %v28_v3 = vld [vmem:[%s383_s2 + $0x8] sm:$0xff]  ;;  %v30_v4 = vld [vmem:[%s383_s2 + $0x18] sm:$0xff] }
   0x2   :  { %88 = vperm.xlu0 %247, %v27_v0   ;;  %60 = vperm.xlu1 %246, %v27_v0  }
   0x3   :  { %11 = vsyncpa [#allocation3], 0  ;;  %v29_v5 = vld [vmem:[%s383_s2 + $0x10] sm:$0xff]  ;;  %v150_v6 = vld [vmem:[%s385_s4 + $0x8] sm:$0xff]  ;;  %v284_v7 = vmov 0   ;;  %vm215_vm0 = vcmask 1040384  }
   0x4   :  { %v117_v8 = vld [vmem:[%s384_s3] sm:$0xff]  ;;  %v120_v9 = vld [vmem:[%s384_s3 + $0x18] sm:$0xff]  ;;  %v118_v10 = vld [vmem:[%s384_s3 + $0x8] sm:$0xff] }
   0x5   :  { %v119_v11 = vld [vmem:[%s384_s3 + $0x10] sm:$0xff]  ;;  %v152_v12 = vld [vmem:[%s385_s4 + $0x18] sm:$0xff]  ;;  %v149_v13 = vld [vmem:[%s385_s4] sm:$0xff] }
   0x6   :  { %250 = vset.pattern.permute.xlu0 %v283_v2  ;;  %64 = vperm.xlu1 %246, %v28_v3   ;;  %v151_v14 = vld [vmem:[%s385_s4 + $0x10] sm:$0xff]  ;;  %v217_v15 = vld [vmem:[%s386_s5] sm:$0x3] }
   0x7   :  { %72 = vperm.xlu0 %250, %v30_v4   ;;  %v239_v28 = vld [vmem:[%s381_s0] ss:$0 sm:$0xff]  ;;  %v240_v30 = vld [vmem:[%s381_s0 + $0x1] ss:$0 sm:$0xff]  ;;  %s285_s0 = smov [#allocation2]  }
   0x8   :  { %v241_v36 = vld [vmem:[%s382_s1] ss:$0 sm:$0xff]  ;;  %s231_s1 = sshll.u32 %s285_s0, 4  ;;  %s232_s1 = int_to_ptr.vmem [resolvable:$true] %s231_s1 }
   0x9   :  { %s258_s25 = scalar_lea.vmem %s232_s1, 32  ;;  %p263_p1 = scmp.lt.s32.totalorder %s232_s1, %s232_s1 }
   0xa   :  { %68 = vperm.xlu1 %246, %v29_v5   ;;  %p259_p0 = scmp.ne.s32.totalorder %s232_s1, %s258_s25  ;;  %p264_p2 = scmp.lt.s32.totalorder %s258_s25, %s258_s25 }
   0xb   :  { %191 = vperm.xlu0 %250, %v150_v6  }
   0xc   :  { %p265_p3 = por %p264_p2, %p263_p1 }
   0xe   :  { %248 = vset.pattern.permute.xlu1 %v282_v1  ;;  %p266_p4 = pnand %p265_p3, %p259_p0 }
   0xf   :  { %254 = vset.pattern.permute.xlu0 %v284_v7  ;;  %92 = vperm.xlu1 %248, %v28_v3  }
  0x10   :  { %33 = vperm.xlu0 %254, %v27_v0  }
  0x13   :  { %249 = vset.pattern.permute.xlu1 %v284_v7 }
  0x14   :  { %38 = vperm.xlu0 %254, %v28_v3   ;;  %48 = vperm.xlu1 %249, %v30_v4  }
  0x18   :  { %43 = vperm.xlu0 %254, %v29_v5   ;;  %251 = vset.pattern.permute.xlu1 %v282_v1 }
  0x19   :  { %96 = vperm.xlu1 %251, %v29_v5  }
  0x1c   :  { %123 = vperm.xlu0 %254, %v117_v8  }
  0x1d   :  { %100 = vperm.xlu1 %251, %v30_v4  }
  0x20   :  { %138 = vperm.xlu0 %254, %v120_v9  }
  0x21   :  { %252 = vset.pattern.permute.xlu1 %v284_v7 }
  0x22   :  { %128 = vperm.xlu1 %252, %v118_v10  }
  0x24   :  { %160 = vperm.xlu0 %254, %v150_v6  }
  0x26   :  { %133 = vperm.xlu1 %252, %v119_v11  }
  0x28   :  { %170 = vperm.xlu0 %254, %v152_v12  }
  0x2a   :  { %155 = vperm.xlu1 %252, %v149_v13  }
  0x2e   :  { %253 = vset.pattern.permute.xlu1 %v283_v2 }
  0x2f   :  { %187 = vperm.xlu1 %253, %v149_v13  }
  0x33   :  { %255 = vset.pattern.permute.xlu1 %v284_v7 }
  0x34   :  { %165 = vperm.xlu1 %255, %v151_v14  }
  0x38   :  { %256 = vset.pattern.permute.xlu1 %v283_v2 }
  0x39   :  { %195 = vperm.xlu1 %256, %v151_v14  }
  0x3d   :  { %199 = vperm.xlu1 %256, %v152_v12  }
  0x41   :  { %257 = vset.pattern.permute.xlu1 %v284_v7 }
  0x42   :  { %220 = vperm.xlu1 %257, %v217_v15  }
  0x81   :  { %v61_v16 = vpop.permute.xlu1 %60  ;;  %v89_v17 = vpop.permute.xlu0 %88 }
  0x82   :  { %v79_v33 = vmul.f32 %v240_v30, %v61_v16  ;;  %v109_v38 = vmul.f32 %v241_v36, %v89_v17 }
  0x85   :  { %v65_v18 = vpop.permute.xlu1 %64 }
  0x86   :  { %v73_v19 = vpop.permute.xlu0 %72  ;;  %v80_v37 = vmul.f32 %v240_v30, %v65_v18 }
  0x87   :  { %v82_v43 = vmul.f32 %v240_v30, %v73_v19 }
  0x89   :  { %v69_v20 = vpop.permute.xlu1 %68 }
  0x8a   :  { %v192_v21 = vpop.permute.xlu0 %191  ;;  %v81_v44 = vmul.f32 %v240_v30, %v69_v20 }
  0x8e   :  { %v93_v22 = vpop.permute.xlu1 %92 }
  0x8f   :  { %v34_v23 = vpop.permute.xlu0 %33  ;;  %v110_v45 = vmul.f32 %v241_v36, %v93_v22 }
  0x90   :  { %v55_v31 = vmul.f32 %v239_v28, %v34_v23 }
  0x92   :  { %v83_v39 = vadd.f32 %v79_v33, %v55_v31 }
  0x93   :  { %v49_v24 = vpop.permute.xlu1 %48  ;;  %v39_v25 = vpop.permute.xlu0 %38 }
  0x94   :  { %v56_v32 = vmul.f32 %v239_v28, %v39_v25  ;;  %v58_v46 = vmul.f32 %v239_v28, %v49_v24  ;;  %v113_v47 = vadd.f32 %v109_v38, %v83_v39 }
  0x96   :  { %v84_v40 = vadd.f32 %v80_v37, %v56_v32  ;;  %v86_v54 = vadd.f32 %v82_v43, %v58_v46 }
  0x97   :  { %v44_v27 = vpop.permute.xlu0 %43 }
  0x98   :  { %v97_v26 = vpop.permute.xlu1 %96  ;;  %v57_v41 = vmul.f32 %v239_v28, %v44_v27  ;;  %v114_v52 = vadd.f32 %v110_v45, %v84_v40 }
  0x99   :  { %v111_v50 = vmul.f32 %v241_v36, %v97_v26 }
  0x9a   :  { %v85_v49 = vadd.f32 %v81_v44, %v57_v41 }
  0x9b   :  { %v124_v34 = vpop.permute.xlu0 %123 }
  0x9c   :  { %v101_v29 = vpop.permute.xlu1 %100  ;;  %v141_v55 = vadd.f32 %v124_v34, %v113_v47  ;;  %v115_v58 = vadd.f32 %v111_v50, %v85_v49 }
  0x9d   :  { %v112_v51 = vmul.f32 %v241_v36, %v101_v29 }
  0x9e   :  { %v145_v60 = vmax.f32 %v141_v55, 0.0 }
  0x9f   :  { %v139_v48 = vpop.permute.xlu0 %138  ;;  %v116_v57 = vadd.f32 %v112_v51, %v86_v54 }
  0xa1   :  { %v129_v35 = vpop.permute.xlu1 %128  ;;  %v144_v0 = vadd.f32 %v139_v48, %v116_v57 }
  0xa2   :  { %v142_v56 = vadd.f32 %v129_v35, %v114_v52 }
  0xa3   :  { %v161_v59 = vpop.permute.xlu0 %160  ;;  %v148_v6 = vmax.f32 %v144_v0, 0.0 }
  0xa4   :  { %v146_v61 = vmax.f32 %v142_v56, 0.0 }
  0xa5   :  { %v134_v42 = vpop.permute.xlu1 %133 }
  0xa6   :  { %v143_v62 = vadd.f32 %v134_v42, %v115_v58  ;;  %v174_v2 = vmul.f32 %v161_v59, %v146_v61  ;;  %v203_v14 = vmul.f32 %v192_v21, %v146_v61 }
  0xa7   :  { %v171_v4 = vpop.permute.xlu0 %170 }
  0xa8   :  { %v147_v3 = vmax.f32 %v143_v62, 0.0  ;;  %v176_v9 = vmul.f32 %v171_v4, %v148_v6 }
  0xa9   :  { %v156_v53 = vpop.permute.xlu1 %155 }
  0xaa   :  { %v173_v1 = vmul.f32 %v156_v53, %v145_v60 }
  0xac   :  { %v177_v7 = vadd.f32 %v174_v2, %v173_v1 }
  0xae   :  { %v188_v63 = vpop.permute.xlu1 %187 }
  0xaf   :  { %v202_v11 = vmul.f32 %v188_v63, %v145_v60 }
  0xb1   :  { %v206_v17 = vadd.f32 %v203_v14, %v202_v11 }
  0xb3   :  { %v166_v5 = vpop.permute.xlu1 %165 }
  0xb4   :  { %v175_v8 = vmul.f32 %v166_v5, %v147_v3 }
  0xb6   :  { %v178_v10 = vadd.f32 %v177_v7, %v175_v8 }
  0xb8   :  { %v179_v12 = vadd.f32 %v178_v10, %v176_v9  ;;  %v196_v13 = vpop.permute.xlu1 %195 }
  0xb9   :  { %v204_v15 = vmul.f32 %v196_v13, %v147_v3 }
  0xba   :  { %v180_v16 = vrot.slane %v179_v12, 4 }
  0xbb   :  { %v207_v20 = vadd.f32 %v206_v17, %v204_v15 }
  0xbc   :  { %v181_v18 = vadd.f32 %v180_v16, %v179_v12  ;;  %v200_v19 = vpop.permute.xlu1 %199 }
  0xbd   :  { %v205_v22 = vmul.f32 %v200_v19, %v148_v6 }
  0xbe   :  { %v182_v23 = vrot.slane %v181_v18, 2 }
  0xbf   :  { %v208_v24 = vadd.f32 %v207_v20, %v205_v22 }
  0xc0   :  { %v183_v27 = vadd.f32 %v182_v23, %v181_v18 }
  0xc1   :  { %v209_v25 = vrot.slane %v208_v24, 4  ;;  %v221_v32 = vpop.permute.xlu1 %220 }
  0xc2   :  { %v184_v30 = vrot.slane %v183_v27, 1 }
  0xc3   :  { %v210_v26 = vadd.f32 %v209_v25, %v208_v24 }
  0xc4   :  { %v185_v33 = vadd.f32 %v184_v30, %v183_v27 }
  0xc5   :  { %v211_v28 = vrot.slane %v210_v26, 2 }
  0xc7   :  { %v212_v29 = vadd.f32 %v211_v28, %v210_v26 }
  0xc9   :  { %v213_v31 = vrot.slane %v212_v29, 1 }
  0xcb   :  { %v214_v21 = vadd.f32 %v213_v31, %v212_v29 }
  0xcd   :  { %v216_v34 = vsel %vm215_vm0, %v185_v33, %v214_v21 }
  0xce   :  { %v223_v35 = vadd.f32 %v221_v32, %v216_v34 }
  0xd0   :  { %224 = vst [vmem:[#allocation2] sm:$0x3] %v223_v35 }
  0xd1   :  { %269 = shalt.err (!%p266_p4)
}
  0xd2   :  { %s270_s28 = scalar_lea.hbm %s387_s6, 32 }
  0xd3   :  { %p271_p5 = scmp.ne.s32.totalorder %s387_s6, %s270_s28  ;;  %p274_p6 = scmp.lt.u32.totalorder %s270_s28, %s387_s6 }
  0xd5   :  { %p276_p7 = pnand %p274_p6, %p271_p5 }
  0xd7   :  { %279 = shalt.err (!%p276_p7)
}
  0xd8   :  { %234 = dma.vmem_to_hbm [thread:$0]  %s232_s1, 32, %s387_s6, [#allocation3]  }
  0xd9   :  { %280 = dma.done.wait [#allocation3], 32  }
  0xda   :  { %281 = vsyncadd [#allocation3], 4294967264 }
  0xdb   :  { %238 = vsyncpa [#allocation3], 1 }

</bundles_post_ra>
